<compile_context>
chip_gen: v7x
topology: tpu7x:2x2x1
jax: 0.10.0
libtpu: 0.0.40
codegen_flags: <defaults>
</compile_context>

<pallas_src>
import jax
import jax.numpy as jnp
from jax.experimental import pallas as pl
from jax.experimental.pallas import tpu as pltpu


def _patch_embed_kernel(p_ref, w_ref, pos_ref, o_ref):
    # p_ref:   (1, TM, K)  bf16   patch pixels for TM tokens of one image
    # w_ref:   (K, TN)     bf16   projection weight slab (resident)
    # pos_ref: (TM, TN)    f32    position embedding rows (+ folded conv bias)
    # o_ref:   (1, TM, TN) f32
    acc = jnp.dot(p_ref[0], w_ref[...],
                  preferred_element_type=jnp.float32)      # MXU, f32 accumulate
    o_ref[0] = (acc + pos_ref[...]).astype(o_ref.dtype)


def _pick_row_tile(n):
    # Largest multiple-of-8 divisor of n up to 256, else the full dimension.
    best = None
    for t in range(8, min(n, 256) + 1, 8):
        if n % t == 0:
            best = t
    return best if best is not None else n


def _pick_col_tile(d):
    # Largest multiple-of-128 tile (<= 512) dividing d, else the full dimension.
    for t in (512, 384, 256, 128):
        if d % t == 0:
            return t
    return d


def patch_embeddings(x, conv_w, conv_b, cls_token, pos_embed, patch_size):
    """x: (B, C, H, W) NCHW float32. Returns (B, num_patches + 1, embed_dim)."""
    B, C, H, W = x.shape
    P = patch_size
    Hp, Wp = H // P, W // P
    N = Hp * Wp
    D = conv_w.shape[0]                      # Conv2d weight: (D, C, P, P)
    K = C * P * P

    # im2col (XLA): non-overlapping patches, each flattened (C, ph, pw)
    # row-major to match Conv2d weight layout.
    patches = x.reshape(B, C, Hp, P, Wp, P)
    patches = patches.transpose(0, 2, 4, 1, 3, 5)            # (B, Hp, Wp, C, P, P)
    patches = patches.reshape(B, N, K).astype(jnp.bfloat16)  # bf16 MXU operand

    # Conv weight -> (K, D) matmul weight with matching K ordering.
    w_mat = conv_w.reshape(D, K).T.astype(jnp.bfloat16)      # (K, D) bf16

    pos = pos_embed.reshape(N + 1, D)
    # Fold conv bias into the patch-row position embeddings (batch-invariant).
    pos_body = (pos[1:, :] + conv_b[None, :]).astype(jnp.float32)   # (N, D)

    TM = _pick_row_tile(N)
    TN = _pick_col_tile(D)

    out_body = pl.pallas_call(
        _patch_embed_kernel,
        out_shape=jax.ShapeDtypeStruct((B, N, D), jnp.float32),
        grid_spec=pltpu.PrefetchScalarGridSpec(
            num_scalar_prefetch=0,
            grid=(B, N // TM, D // TN),
            in_specs=[
                pl.BlockSpec((1, TM, K), lambda b, i, j: (b, i, 0)),
                pl.BlockSpec((K, TN),    lambda b, i, j: (0, j)),
                pl.BlockSpec((TM, TN),   lambda b, i, j: (i, j)),
            ],
            out_specs=pl.BlockSpec((1, TM, TN), lambda b, i, j: (b, i, j)),
        ),
        compiler_params=pltpu.CompilerParams(
            dimension_semantics=("parallel", "parallel", "parallel"),
            vmem_limit_bytes=64 * 1024 * 1024),
    )(patches, w_mat, pos_body)

    # Batch-invariant cls row(s): computed once, broadcast and concatenated in
    # the wrapper (hoisted out of the kernel to keep 8-aligned output tiles).
    row0 = (cls_token.reshape(C, D) + pos[0:1, :]).astype(jnp.float32)  # (C, D); C == 1
    row0 = jnp.broadcast_to(row0[None, :, :], (B, C, D))
    return jnp.concatenate([row0, out_body], axis=1)


if __name__ == "__main__":
    # Small, module-consistent shapes (in_channels = 1 as the module requires
    # for the position-embedding broadcast; D a multiple of 128 for lane-dense
    # stores).
    B, C, H, W = 2, 1, 16, 16
    P = 4                                    # patch_size
    N = (H // P) * (W // P)                  # num_patches = 16
    D = 128                                  # embed_dim

    key = jax.random.PRNGKey(0)
    kx, kw, kb, kc, kp = jax.random.split(key, 5)
    x = jax.random.normal(kx, (B, C, H, W), dtype=jnp.float32)
    conv_w = jax.random.normal(kw, (D, C, P, P), dtype=jnp.float32) * 0.1
    conv_b = jax.random.normal(kb, (D,), dtype=jnp.float32) * 0.1
    cls_token = jax.random.normal(kc, (1, C, D), dtype=jnp.float32)
    pos_embed = jax.random.normal(kp, (1, N + 1, D), dtype=jnp.float32)

    out = patch_embeddings(x, conv_w, conv_b, cls_token, pos_embed, P)
    out = jax.block_until_ready(out)

    # Plain-JAX (f32) reference of the same forward pass.
    patches = x.reshape(B, C, H // P, P, W // P, P).transpose(0, 2, 4, 1, 3, 5)
    patches = patches.reshape(B, N, C * P * P)
    proj = patches @ conv_w.reshape(D, -1).T + conv_b[None, None, :]
    cls = jnp.broadcast_to(cls_token, (B, C, D))
    ref = jnp.concatenate([cls, proj], axis=1) + pos_embed

    assert out.shape == (B, N + 1, D)
    # bf16 MXU operands -> slightly looser tolerance vs. the f32 reference.
    assert jnp.allclose(out, ref, atol=3e-2, rtol=3e-2)
    print("KERNEL_OK")
</pallas_src>

<mosaic_0001>
module attributes {stable_mosaic.version = 11 : i64} {
  func.func @_patch_embed_kernel(%arg0: i32, %arg1: i32, %arg2: i32, %arg3: memref<1x16x16xbf16, #tpu.memory_space<vmem>>, %arg4: memref<16x128xbf16, #tpu.memory_space<vmem>>, %arg5: memref<16x128xf32, #tpu.memory_space<vmem>>, %arg6: memref<1x16x128xf32, #tpu.memory_space<vmem>>) attributes {dimension_semantics = [#tpu.dimension_semantics<parallel>, #tpu.dimension_semantics<parallel>, #tpu.dimension_semantics<parallel>], iteration_bounds = array<i64: 2, 1, 1>, scalar_prefetch = 0 : i64, scratch_operands = 0 : i64, tpu.core_type = #tpu.core_type<tc>, window_params = [{transform_indices = @transform_0, window_bounds = array<i64: 1, 16, 16>}, {transform_indices = @transform_1, window_bounds = array<i64: 16, 128>}, {transform_indices = @transform_2, window_bounds = array<i64: 16, 128>}, {transform_indices = @transform_3, window_bounds = array<i64: 1, 16, 128>}]} {
    %c0 = arith.constant 0 : index
    %c0_0 = arith.constant 0 : index
    %c0_1 = arith.constant 0 : index
    %0 = vector.load %arg3[%c0, %c0_0, %c0_1] : memref<1x16x16xbf16, #tpu.memory_space<vmem>>, vector<1x16x16xbf16>
    %1 = vector.shape_cast %0 : vector<1x16x16xbf16> to vector<16x16xbf16>
    %c0_2 = arith.constant 0 : index
    %c0_3 = arith.constant 0 : index
    %2 = vector.load %arg4[%c0_2, %c0_3] : memref<16x128xbf16, #tpu.memory_space<vmem>>, vector<16x128xbf16>
    %cst = arith.constant dense<0.000000e+00> : vector<16x128xf32>
    %3 = tpu.matmul %1, %2, %cst {dimension_numbers = #tpu.dot_dimension_numbers<[1], [0], [0], [1], [0, 0, 1, 1], [], []>} : vector<16x16xbf16>, vector<16x128xbf16>, vector<16x128xf32> -> vector<16x128xf32>
    %c0_4 = arith.constant 0 : index
    %c0_5 = arith.constant 0 : index
    %4 = vector.load %arg5[%c0_4, %c0_5] : memref<16x128xf32, #tpu.memory_space<vmem>>, vector<16x128xf32>
    %5 = arith.addf %3, %4 : vector<16x128xf32>
    %c0_6 = arith.constant 0 : index
    %c0_7 = arith.constant 0 : index
    %c0_8 = arith.constant 0 : index
    %6 = vector.load %arg6[%c0_6, %c0_7, %c0_8] : memref<1x16x128xf32, #tpu.memory_space<vmem>>, vector<1x16x128xf32>
    %7 = vector.shape_cast %6 : vector<1x16x128xf32> to vector<16x128xf32>
    %8 = vector.shape_cast %5 : vector<16x128xf32> to vector<1x16x128xf32>
    tpu.vector_store %arg6[%c0_6, %c0_7, %c0_8], %8 {strides = array<i32>} : memref<1x16x128xf32, #tpu.memory_space<vmem>>, vector<1x16x128xf32>,
    return
  }
  func.func @transform_0(%arg0: i32, %arg1: i32, %arg2: i32) -> (i32, i32, i32) {
    %c0_i32 = arith.constant 0 : i32
    %c0_i32_0 = arith.constant 0 : i32
    return %arg0, %arg1, %c0_i32 : i32, i32, i32
  }
  func.func @transform_1(%arg0: i32, %arg1: i32, %arg2: i32) -> (i32, i32) {
    %c0_i32 = arith.constant 0 : i32
    %c0_i32_0 = arith.constant 0 : i32
    return %c0_i32, %arg2 : i32, i32
  }
  func.func @transform_2(%arg0: i32, %arg1: i32, %arg2: i32) -> (i32, i32) {
    %c0_i32 = arith.constant 0 : i32
    return %arg1, %arg2 : i32, i32
  }
  func.func @transform_3(%arg0: i32, %arg1: i32, %arg2: i32) -> (i32, i32, i32) {
    %c0_i32 = arith.constant 0 : i32
    return %arg0, %arg1, %arg2 : i32, i32, i32
  }
}

</mosaic_0001>

<bundles_post_ra>
// kernel: tpu_custom_call.1
= control target key start
LH: loop header
LB: loop body
LE: loop exit
PB: predicated region body
PF: predicated region fallthrough
CT: control target
= control target key end

     0   :  { %8 = vsyncpa [#allocation3], 0  ;;  %s1057_s0 = inlined_call_operand.hbm [shape: bf16[2,16,16], index: 0, kind: input, shape index: {}]   ;;  %s1058_s1 = inlined_call_operand.hbm [shape: bf16[16,128], index: 1, kind: input, shape index: {}]   ;;  %s1059_s2 = inlined_call_operand.hbm [shape: f32[16,128], index: 2, kind: input, shape index: {}]   ;;  %s1060_s3 = inlined_call_operand.hbm [shape: f32[2,16,128], index: 3, kind: output, shape index: {}]  }
   0x1   :  { %10 = vsyncpa [#allocation3 + $0x1], 0 }
   0x2   :  { %11 = vsyncpa [#allocation6], 0 }
   0x3   :  { %12 = vsyncpa [#allocation4], 0 }
   0x4   :  { %14 = vsyncpa [#allocation4 + $0x1], 0  ;;  %s795_s12 = smov 0   ;;  %s797_s13 = smov 0  }
   0x5   :  { %s799_s14 = smov 0   ;;  %s801_s15 = smov 0  }
   0x6   :  { %s803_s16 = smov 0   ;;  %s805_s17 = smov 0  }
   0x7 LB: > { %s464_s18 = sadd.s32 4294967295, %s761_s17   ;;  %s465_s19 = sadd.s32 4294967294, %s761_s17   ;;  %s761_s17 = sphi %s805_s17, %s20_s17   ;;  %s757_s16 = sphi %s803_s16, %s1082_s16   ;;  %s753_s15 = sphi %s801_s15, %s1081_s15   ;;  %s749_s14 = sphi %s799_s14, %s1080_s14   ;;  %s745_s13 = sphi %s797_s13, %s1079_s13   ;;  %s741_s12 = sphi %s795_s12, %s1078_s12  }
   0x8   : > { %p61_p0 = scmp.ne.s32.totalorder %s745_s13, %s741_s12  ;;  %p829_p1 = scmp.eq.s32.totalorder %s464_s18, 0 }
   0x9   : > { %p833_p2 = scmp.eq.s32.totalorder %s464_s18, 1  ;;  %p149_p3 = scmp.eq.s32.totalorder %s465_s19, 1 }
   0xa   : > { %s1065_s20 = scalar_select %p829_p1, 1, 0 }
   0xb   : > { %p839_p4 = por %p829_p1, %p61_p0  ;;  %p466_p5 = scmp.ge.s32.totalorder %s761_s17, 1 }
   0xc   : > { %p844_p6 = por %p149_p3, %p61_p0  ;;  %p156_p7 = scmp.lt.s32.totalorder %s761_s17, 3 }
   0xd   : > { %s1067_s22 = scalar_select %p839_p4, 1, 0 }
   0xe   : > { %s1068_s23 = scalar_select %p844_p6, 1, 0 }
   0xf   : > { %p849_p8 = pnand %p466_p5, %p156_p7  ;;  %s763_s25 = smov [#allocation5]  }
  0x10   : > { %s170_s26 = sshll.u32 %s763_s25, 4  ;;  %s764_s28 = smov [#allocation7]   ;;  %s853_s26 = int_to_ptr.vmem [resolvable:$true] %s170_s26 }
  0x11   : > { %p508_p9 = pneg %p849_p8  ;;  %s187_s29 = sshll.u32 %s764_s28, 4  ;;  %s864_s29 = int_to_ptr.vmem [resolvable:$true] %s187_s29 }
  0x12   : > { %s589_s5 = scalar_lea.hbm %s1058_s1, 128 }
  0x13   : > { %p860_p11 = pnand %p508_p9, %p829_p1  ;;  %p590_p12 = scmp.ne.s32.totalorder %s1058_s1, %s589_s5 }
  0x14   : > { %p596_p5 = scmp.lt.u32.totalorder %s589_s5, %s1058_s1 }
  0x15   : > { %p591_p13 = pneg %p860_p11 }
  0x17   : > { %p592_p0 = pnand %p591_p13, %p590_p12 }
  0x19   : > { %p593_p3 = pneg %p592_p0 }
  0x1b   : > { %p598_p7 = pnand %p596_p5, %p593_p3 }
  0x1d   : > { %601 = shalt.err (!%p598_p7)
}
  0x1e   : > { %s602_s10 = scalar_lea.vmem %s853_s26, 128  ;;  %p610_p1 = scmp.lt.s32.totalorder %s853_s26, %s853_s26 }
  0x1f   : > { %p603_p9 = scmp.ne.s32.totalorder %s853_s26, %s602_s10  ;;  %p611_p12 = scmp.lt.s32.totalorder %s602_s10, %s602_s10 }
  0x21   : > { %p605_p10 = pnand %p603_p9, %p591_p13  ;;  %p612_p0 = por %p611_p12, %p610_p1 }
  0x23   : > { %p606_p6 = pneg %p605_p10 }
  0x25   : > { %p613_p4 = pnand %p612_p0, %p606_p6 }
  0x27   : > { %616 = shalt.err (!%p613_p4)
}
  0x28   : > { %s765_s11 = smov 64   ;;  %s766_s18 = smov 4  }
  0x29   : > { %511 = dma.hbm_to_vmem [thread:$0]  (!%p860_p11), %s1058_s1, 128, %s853_s26, [#allocation6], %s765_s11, %s765_s11, %s766_s18  }
  0x2a   : > { %s617_s4 = scalar_lea.hbm %s1059_s2, 256 }
  0x2b   : > { %p618_p1 = scmp.ne.s32.totalorder %s1059_s2, %s617_s4  ;;  %p624_p10 = scmp.lt.u32.totalorder %s617_s4, %s1059_s2 }
  0x2d   : > { %p620_p4 = pnand %p618_p1, %p591_p13 }
  0x2f   : > { %p621_p6 = pneg %p620_p4 }
  0x31   : > { %p626_p3 = pnand %p624_p10, %p621_p6 }
  0x33   : > { %629 = shalt.err (!%p626_p3)
}
  0x34   : > { %s630_s26 = scalar_lea.vmem %s864_s29, 256  ;;  %p638_p12 = scmp.lt.s32.totalorder %s864_s29, %s864_s29 }
  0x35   : > { %p631_p5 = scmp.ne.s32.totalorder %s864_s29, %s630_s26  ;;  %p639_p0 = scmp.lt.s32.totalorder %s630_s26, %s630_s26 }
  0x37   : > { %p633_p7 = pnand %p631_p5, %p591_p13  ;;  %p640_p1 = por %p639_p0, %p638_p12 }
  0x39   : > { %p634_p9 = pneg %p633_p7 }
  0x3b   : > { %p641_p4 = pnand %p640_p1, %p634_p9 }
  0x3d   : > { %644 = shalt.err (!%p641_p4)
}
  0x3e   : > { %s767_s9 = smov 128   ;;  %s768_s10 = smov 8  }
  0x3f   : > { %514 = dma.hbm_to_vmem [thread:$0]  (!%p860_p11), %s1059_s2, 256, %s864_s29, [#allocation6], %s767_s9, %s767_s9, %s768_s10  }
  0x40   : > { %s39_s28 = sadd.s32 1, %s757_s16  ;;  %s48_s30 = sadd.s32 1, %s749_s14 }
  0x41   : > { %p41_p13 = scmp.ge.s32.totalorder %s39_s28, 2  ;;  %p55_p6 = scmp.ne.s32.totalorder %s749_s14, %s745_s13 }
  0x42   : > { %p56_p10 = scmp.eq.s32.totalorder %s761_s17, 0  ;;  %p525_p3 = scmp.lt.s32.totalorder %s761_s17, 2 }
  0x43   : > { %s1084_s28 = smov (%p41_p13, %s39_s28), 0  ;;  %p931_p7 = por %p833_p2, %p55_p6 }
  0x44   : > { %p57_p5 = por %p56_p10, %p55_p6  ;;  %s43_s27 = ssub.s32 %s757_s16, %s1084_s28 }
  0x45   : > { %s1071_s4 = scalar_select %p931_p7, 1, 0 }
  0x46   : > { %s201_s5 = sand.u32 1, %s749_s14   ;;  %p46_p9 = scmp.eq.s32.totalorder %s43_s27, 0 }
  0x47   : > { %s470_s29 = sshll.u32 %s201_s5, 3  ;;  %s486_s6 = sshll.u32 %s757_s16, 7 }
  0x48   : > { %s940_s7 = scalar_select %p46_p9, %s749_s14, %s48_s30  }
  0x49   : > { %s945_s9 = scalar_lea.hbm %s1057_s0, %s486_s6  ;;  %s205_s21 = scalar_lea.vmem [#allocation2], %s470_s29 }
  0x4a   : > { %s214_s10 = sshll.u32 %s205_s21, 4  ;;  %p949_p2 = pnand %p525_p3, %p57_p5  ;;  %s953_s10 = int_to_ptr.vmem [resolvable:$true] %s214_s10 }
  0x4b   : > { %s955_s25 = scalar_lea.sflag [#allocation3], %s201_s5  ;;  %s645_s30 = scalar_lea.hbm %s945_s9, 128 }
  0x4c   : > { %p646_p11 = scmp.ne.s32.totalorder %s945_s9, %s645_s30  ;;  %p647_p12 = pneg %p949_p2 }
  0x4d   : > { %s650_s6 = scalar_lea.hbm %s1057_s0, 256  ;;  %p651_p4 = scmp.lt.u32.totalorder %s945_s9, %s1057_s0 }
  0x4e   : > { %p648_p0 = pnand %p647_p12, %p646_p11  ;;  %p652_p13 = scmp.lt.u32.totalorder %s650_s6, %s645_s30 }
  0x4f   : > { %p654_p10 = scmp.lt.u32.totalorder %s645_s30, %s945_s9 }
  0x50   : > { %p649_p1 = pneg %p648_p0  ;;  %p653_p6 = por %p652_p13, %p651_p4 }
  0x52   : > { %p655_p3 = por %p654_p10, %p653_p6 }
  0x54   : > { %p656_p5 = pnand %p655_p3, %p649_p1 }
  0x56   : > { %659 = shalt.err (!%p656_p5)
}
  0x57   : > { %s660_s5 = scalar_lea.vmem %s953_s10, 128  ;;  %s769_s21 = smov [#allocation2]  }
  0x58   : > { %p661_p9 = scmp.ne.s32.totalorder %s953_s10, %s660_s5  ;;  %s665_s27 = sshll.u32 %s769_s21, 4  ;;  %s666_s27 = int_to_ptr.vmem [resolvable:$false] %s665_s27 }
  0x59   : > { %s667_s29 = scalar_lea.vmem %s666_s27, 256  ;;  %p668_p7 = scmp.lt.s32.totalorder %s953_s10, %s666_s27 }
  0x5a   : > { %p663_p11 = pnand %p661_p9, %p647_p12  ;;  %p669_p4 = scmp.lt.s32.totalorder %s667_s29, %s660_s5 }
  0x5c   : > { %p664_p0 = pneg %p663_p11  ;;  %p670_p13 = por %p669_p4, %p668_p7 }
  0x5e   : > { %p671_p6 = pnand %p670_p13, %p664_p0 }
  0x60   : > { %674 = shalt.err (!%p671_p6)
}
  0x61   : > { %518 = dma.hbm_to_vmem [thread:$0]  (!%p949_p2), %s945_s9, 128, %s953_s10, %s955_s25, %s765_s11, %s765_s11, %s766_s18  }
  0x62   : > { %226 = sbr.rel (%p849_p8) target bundleno = 345 (0x159), region = 32  ;;  %s989_s30 = sand.u32 (!%p849_p8), 1, %s745_s13  }
  0x63   : > { %s474_s6 = sshll.u32 (!%p849_p8), %s989_s30, 3  ;;  %s229_s8 = scalar_lea.sflag (!%p849_p8), [#allocation3], %s989_s30 }
  0x64   : > { %s232_s26 = scalar_lea.vmem (!%p849_p8), [#allocation2], %s474_s6  ;;  %p1073_p7 = scmp.ne.s32.totalorder (!%p849_p8), %s1067_s22, 0 }
  0x69   : > { %728 = dma.done.wait (%p1073_p7), %s229_s8, 128  }
  0x6a   : > { %730 = vsyncadd (%p1073_p7), %s229_s8, 4294967168  ;;  %p1074_p12 = scmp.ne.s32.totalorder %s1065_s20, 0 }
  0x6c   : > { %732 = dma.done.wait (%p1074_p12), [#allocation6], 384  }
  0x6d   : > { %734 = vsyncadd (%p1074_p12), [#allocation6], 4294966912  ;;  %v770_v0 = vmov 0.0   ;;  %vm771_vm0 = vmmov 0   ;;  %v587_v1 = vld [vmem:[#allocation5] sm:$0xff]   ;;  %v588_v2 = vld [vmem:[%s232_s26] sm:$0xff]  }
  0x6e   : > { %490 = vmatprep.subr.bf16.mxu0 %v770_v0  ;;  %492 = vmatprep.mubr.msk.bf16.mxu0 %vm771_vm0, %v770_v0  ;;  %vm284_vm1 = vcmask 130048   ;;  %s477_s24 = sshll.u32 %s989_s30, 4  ;;  %v271_v3 = vld [vmem:[#allocation7] sm:$0xff]  ;;  %s487_s18 = sshll.u32 %s753_s15, 8  ;;  %v272_v5 = vld [vmem:[#allocation7 + $0x8] sm:$0xff] }
  0x6f   : > { %491 = vmatpush3.bf16.msra.mxu0 %v587_v1  ;;  %s262_s22 = scalar_lea.vmem [#allocation8], %s477_s24  ;;  %s1008_s10 = scalar_lea.hbm %s1060_s3, %s487_s18 }
  0x70   : > { %s348_s11 = sshll.u32 %s262_s22, 4  ;;  %s332_s15 = scalar_lea.sflag [#allocation4], %s989_s30  ;;  %s1003_s11 = int_to_ptr.vmem [resolvable:$true] %s348_s11 }
  0x71   : > { %s675_s19 = scalar_lea.vmem %s1003_s11, 256  ;;  %p1075_p2 = scmp.ne.s32.totalorder %s1071_s4, 0 }
  0x72   : > { %493 = vmatmul.mubr.msk.bf16.vlgmr.msra.gmra.mrb[0].mxu0 %vm284_vm1, %v588_v2  ;;  %p676_p8 = scmp.ne.s32.totalorder %s1003_s11, %s675_s19  ;;  %s772_s25 = smov [#allocation8]  }
  0x73   : > { %s679_s5 = sshll.u32 %s772_s25, 4  ;;  %s680_s5 = int_to_ptr.vmem [resolvable:$false] %s679_s5 }
  0x74   : > { %p677_p1 = pnand %p676_p8, %p1075_p2  ;;  %s681_s21 = scalar_lea.vmem %s680_s5, 512 }
  0x75   : > { %p682_p3 = scmp.lt.s32.totalorder %s1003_s11, %s680_s5  ;;  %p683_p5 = scmp.lt.s32.totalorder %s681_s21, %s675_s19 }
  0x76   : > { %p678_p10 = pneg %p677_p1 }
  0x77   : > { %p684_p9 = por %p683_p5, %p682_p3 }
  0x79   : > { %p685_p11 = pnand %p684_p9, %p678_p10 }
 0x145   : > { %v322_v4 = vpop.f32.mrb[0].mxu0 }
 0x146   : > { %v323_v6 = vadd.f32 %v322_v4, %v271_v3  ;;  %v494_v7 = vpop.f32.mrb[1].mxu0 }
 0x147   : > { %v325_v8 = vpop.f32.mrb[2].mxu0 }
 0x148   : > { %329 = vst [vmem:[%s262_s22] sm:$0xff] %v323_v6  ;;  %v326_v9 = vadd.f32 %v325_v8, %v272_v5  ;;  %v495_v10 = vpop.f32.mrb[3].mxu0 }
 0x14a   : > { %330 = vst [vmem:[%s262_s22 + $0x8] sm:$0xff] %v326_v9 }
 0x14b   : > { %688 = shalt.err (!%p685_p11)
}
 0x14c   : > { %s689_s27 = scalar_lea.hbm %s1008_s10, 256  ;;  %s693_s8 = scalar_lea.hbm %s1060_s3, 512 }
 0x14d   : > { %p690_p0 = scmp.ne.s32.totalorder %s1008_s10, %s689_s27  ;;  %p694_p6 = scmp.lt.u32.totalorder %s1008_s10, %s1060_s3 }
 0x14e   : > { %p695_p7 = scmp.lt.u32.totalorder %s693_s8, %s689_s27  ;;  %p697_p8 = scmp.lt.u32.totalorder %s689_s27, %s1008_s10 }
 0x14f   : > { %p691_p4 = pnand %p690_p0, %p1075_p2 }
 0x150   : > { %p696_p12 = por %p695_p7, %p694_p6 }
 0x151   : > { %p692_p13 = pneg %p691_p4 }
 0x152   : > { %p698_p1 = por %p697_p8, %p696_p12 }
 0x154   : > { %p699_p10 = pnand %p698_p1, %p692_p13 }
 0x156   : > { %702 = shalt.err (!%p699_p10)
}
 0x157   : > { %s773_s22 = smov 128   ;;  %s774_s18 = smov 8  }
 0x158   : > { %506 = dma.vmem_to_hbm [thread:$0]  (%p1075_p2), %s1003_s11, 256, %s1008_s10, %s332_s15, %s773_s22, %s773_s22, %s774_s18  }
 0x159 PF: > { %s363_s20 = sand.u32 1, %s741_s12   ;;  %p1076_p3 = scmp.ne.s32.totalorder %s1068_s23, 0 }
 0x15a   : > { %p1077_p5 = scmp.ge.s32.totalorder %s761_s17, 2  ;;  %s364_s9 = scalar_lea.sflag [#allocation4], %s363_s20 }
 0x15c   : > { %p520_p9 = pnand %p1077_p5, %p1076_p3 }
 0x15e   : > { %736 = dma.done.wait (!%p520_p9), %s364_s9, 256  }
 0x15f   : > { %738 = vsyncadd (!%p520_p9), %s364_s9, 4294967040  ;;  %s20_s17 = sadd.s32 1, %s761_s17   ;;  %s1078_s12 = smov %s745_s13 }
 0x160   : > { %p17_p11 = scmp.ge.s32.totalorder %s20_s17, 4   ;;  %s1079_s13 = smov %s749_s14 }
 0x161   : > { %s1080_s14 = smov %s940_s7  ;;  %s1081_s15 = smov %s757_s16 }
 0x162   : > { %s1082_s16 = smov %s1084_s28  ;;  %19 = sbr.rel (!%p17_p11) target bundleno = 7 (0x7), region = 87 }
 0x169   :  { %369 = vsyncpa [#allocation3], 1 }
 0x16a   :  { %371 = vsyncpa [#allocation3 + $0x1], 1 }
 0x16b   :  { %372 = vsyncpa [#allocation6], 1 }
 0x16c   :  { %373 = vsyncpa [#allocation4], 1 }
 0x16d   :  { %375 = vsyncpa [#allocation4 + $0x1], 1 }

</bundles_post_ra>
